<compile_context>
chip_gen: v7x
topology: tpu7x:2x2x1
jax: 0.10.0
libtpu: 0.0.40
codegen_flags: <defaults>
</compile_context>

<pallas_src>
from typing import Dict, List, NamedTuple

import numpy as np
import jax
import jax.numpy as jnp
from jax.experimental import pallas as pl
from jax.experimental.pallas import tpu as pltpu


class NestedTensor(NamedTuple):
    tensors: jax.Array
    mask: jax.Array


def _round_up(x: int, m: int) -> int:
    return ((x + m - 1) // m) * m


# --------------------------------------------------------------------------
# Pallas kernel: tiled, K-accumulating matmul + bias + ReLU (one backbone layer)
# --------------------------------------------------------------------------
def _conv_mm_kernel(p_ref, w_ref, b_ref, o_ref, acc_ref):
    # p: (tm, tk) bf16, w: (tk, tn) bf16, b: (1, tn) f32, o: (tm, tn) f32
    @pl.when(pl.program_id(2) == 0)
    def _():
        acc_ref[...] = jnp.zeros_like(acc_ref)

    acc_ref[...] += jnp.dot(p_ref[...], w_ref[...],
                            preferred_element_type=jnp.float32)

    @pl.when(pl.program_id(2) == pl.num_programs(2) - 1)
    def _():
        o_ref[...] = jnp.maximum(acc_ref[...] + b_ref[...], 0.0).astype(o_ref.dtype)


def _conv_matmul(patches_bf16, w2d_bf16, bias_f32):
    """(M,K)bf16 @ (K,Co)bf16 + bias, ReLU, f32 out.  Tiled, padded, pipelined."""
    M, K = patches_bf16.shape
    _, Co = w2d_bf16.shape

    # Tile caps sized for the smallest-VMEM generation (v7x: 64 MiB physical,
    # 32 MiB scoped default).  v5e/v6e (128 MiB) could take larger tk / deeper
    # buffering; these tiles already keep per-step VMEM ~2 MiB with double buffers.
    tm = min(256, _round_up(M, 8))      # sublane multiple
    tn = min(256, _round_up(Co, 128))   # lane-dense output
    tk = min(512, _round_up(K, 128))    # lane-dense contraction

    Mp, Kp, Cop = _round_up(M, tm), _round_up(K, tk), _round_up(Co, tn)

    p = jnp.pad(patches_bf16, ((0, Mp - M), (0, Kp - K)))
    w = jnp.pad(w2d_bf16, ((0, Kp - K), (0, Cop - Co)))
    b = jnp.pad(bias_f32.reshape(1, Co).astype(jnp.float32), ((0, 0), (0, Cop - Co)))

    grid = (Mp // tm, Cop // tn, Kp // tk)

    cost = pl.CostEstimate(
        flops=2 * Mp * Kp * Cop,
        transcendentals=0,
        bytes_accessed=Mp * Kp * 2 + Kp * Cop * 2 + Mp * Cop * 4 + Cop * 4,
    )

    out = pl.pallas_call(
        _conv_mm_kernel,
        out_shape=jax.ShapeDtypeStruct((Mp, Cop), jnp.float32),
        grid_spec=pltpu.PrefetchScalarGridSpec(
            num_scalar_prefetch=0,
            grid=grid,
            in_specs=[
                pl.BlockSpec((tm, tk), lambda i, j, k: (i, k)),
                pl.BlockSpec((tk, tn), lambda i, j, k: (k, j)),
                pl.BlockSpec((1, tn), lambda i, j, k: (0, j)),
            ],
            out_specs=pl.BlockSpec((tm, tn), lambda i, j, k: (i, j)),
            scratch_shapes=[pltpu.VMEM((tm, tn), jnp.float32)],
        ),
        compiler_params=pltpu.CompilerParams(
            dimension_semantics=("parallel", "parallel", "arbitrary"),
            vmem_limit_bytes=32 * 1024 * 1024,
        ),
        cost_estimate=cost,
    )(p, w, b)
    return out[:M, :Co]


def conv3x3_s2_relu(x_nhwc, w_oihw, b):
    """3x3 / stride-2 / pad-1 conv + bias + ReLU. x: (N,H,W,C), w: (Co,Ci,3,3)."""
    N, H, W, C = x_nhwc.shape
    Co, Ci, kh, kw = w_oihw.shape
    assert Ci == C
    stride, pad = 2, 1
    Ho = (H + 2 * pad - kh) // stride + 1
    Wo = (W + 2 * pad - kw) // stride + 1

    # im2col glue in bf16 (halves the materialized patch traffic vs f32).
    xb = x_nhwc.astype(jnp.bfloat16)
    xp = jnp.pad(xb, ((0, 0), (pad, pad), (pad, pad), (0, 0)))
    cols = []
    for di in range(kh):
        for dj in range(kw):
            cols.append(xp[:, di:di + Ho * stride:stride,
                            dj:dj + Wo * stride:stride, :])       # (N,Ho,Wo,C)
    patches = jnp.concatenate(cols, axis=-1).reshape(N * Ho * Wo, kh * kw * C)

    w2d = jnp.transpose(w_oihw, (2, 3, 1, 0)).reshape(kh * kw * C, Co)
    out = _conv_matmul(patches, w2d.astype(jnp.bfloat16), b)      # hot path (Pallas)
    return out.reshape(N, Ho, Wo, Co)


# --------------------------------------------------------------------------
# Nearest-neighbor mask resize (F.interpolate, mode='nearest') as a pure gather.
# Data-movement only -- done in plain JAX per the performance review.
# --------------------------------------------------------------------------
def interp_mask_nearest(mask_bool, h, w):
    """== F.interpolate(m[None].float(), size=(h, w)).to(torch.bool)[0]"""
    N, H, W = mask_bool.shape
    row_idx = (jnp.arange(h) * H) // h            # PyTorch 'nearest': floor(i*in/out)
    col_idx = (jnp.arange(w) * W) // w
    return mask_bool[:, row_idx][:, :, col_idx]


# --------------------------------------------------------------------------
# BackboneBase equivalent
# --------------------------------------------------------------------------
class BackboneBase:
    # TODO(synk): requires_grad_ freezing & IntermediateLayerGetter hook plumbing
    # are training/bookkeeping-only (no forward compute); not represented here.
    def __init__(self, params: Dict[str, tuple], num_channels: int,
                 return_interm_indices: List[int]):
        self.params = params
        self.num_channels = num_channels
        self.return_layers = {
            'layer{}'.format(5 - len(return_interm_indices) + idx): '{}'.format(li)
            for idx, li in enumerate(return_interm_indices)
        }

    def forward(self, tensor_list: NestedTensor) -> Dict[str, NestedTensor]:
        x = jnp.transpose(tensor_list.tensors, (0, 2, 3, 1))   # NCHW -> NHWC, once
        feats = {}
        for li in range(1, 5):
            w, b = self.params['layer{}'.format(li)]
            x = conv3x3_s2_relu(x, w, b)
            feats['layer{}'.format(li)] = x
        out: Dict[str, NestedTensor] = {}
        for lname, oname in self.return_layers.items():
            xf = feats[lname]
            m = tensor_list.mask
            assert m is not None
            mask = interp_mask_nearest(m, xf.shape[1], xf.shape[2])
            # NHWC -> NCHW only at the boundary, to preserve the PyTorch API.
            out[oname] = NestedTensor(jnp.transpose(xf, (0, 3, 1, 2)), mask)
        return out


# --------------------------------------------------------------------------
# Reference (bf16-operand / f32-accumulate, mirroring the kernel's quantization)
# --------------------------------------------------------------------------
def _ref_layer(x_nchw, w, b):
    y = jax.lax.conv_general_dilated(
        x_nchw.astype(jnp.bfloat16), w.astype(jnp.bfloat16),
        window_strides=(2, 2), padding=((1, 1), (1, 1)),
        dimension_numbers=('NCHW', 'OIHW', 'NCHW'),
        preferred_element_type=jnp.float32)
    return jnp.maximum(y + b.reshape(1, -1, 1, 1).astype(jnp.float32), 0.0)


def _ref_mask(mask_bool, h, w):
    N, H, W = mask_bool.shape
    ri = (np.arange(h) * H) // h
    ci = (np.arange(w) * W) // w
    return mask_bool[:, ri][:, :, ci]


if __name__ == "__main__":
    key = jax.random.PRNGKey(0)
    N, C, Hs, Ws = 2, 4, 16, 16
    chans = [C, 8, 16, 32, 64]

    k_x, k_m, *k_w = jax.random.split(key, 2 + 2 * 4)
    x = jax.random.normal(k_x, (N, C, Hs, Ws), dtype=jnp.float32)
    mask = jax.random.bernoulli(k_m, 0.5, (N, Hs, Ws))          # bool (N, H, W)

    params = {}
    for li in range(1, 5):
        ci, co = chans[li - 1], chans[li]
        w = 0.1 * jax.random.normal(k_w[2 * (li - 1)], (co, ci, 3, 3), dtype=jnp.float32)
        b = 0.1 * jax.random.normal(k_w[2 * (li - 1) + 1], (co,), dtype=jnp.float32)
        params['layer{}'.format(li)] = (w, b)

    return_interm_indices = [1, 2, 3]             # -> return layer2, layer3, layer4
    model = BackboneBase(params, num_channels=chans[-1],
                         return_interm_indices=return_interm_indices)

    out = model.forward(NestedTensor(x, mask))
    jax.block_until_ready({k: (v.tensors, v.mask) for k, v in out.items()})

    # reference check
    ref_feats, xr = {}, x
    for li in range(1, 5):
        w, b = params['layer{}'.format(li)]
        xr = _ref_layer(xr, w, b)
        ref_feats['layer{}'.format(li)] = xr
    for lname, oname in model.return_layers.items():
        got = out[oname]
        exp_t = ref_feats[lname]
        exp_m = _ref_mask(np.asarray(mask), exp_t.shape[2], exp_t.shape[3])
        np.testing.assert_allclose(np.asarray(got.tensors), np.asarray(exp_t),
                                   rtol=1e-2, atol=1e-2)
        np.testing.assert_array_equal(np.asarray(got.mask), exp_m)

    print("KERNEL_OK")
</pallas_src>

<mosaic_0001>
module attributes {stable_mosaic.version = 11 : i64} {
  func.func @_conv_mm_kernel(%arg0: i32, %arg1: i32, %arg2: i32, %arg3: memref<128x128xbf16, #tpu.memory_space<vmem>>, %arg4: memref<128x128xbf16, #tpu.memory_space<vmem>>, %arg5: memref<1x128xf32, #tpu.memory_space<vmem>>, %arg6: memref<128x128xf32, #tpu.memory_space<vmem>>, %arg7: memref<128x128xf32, #tpu.memory_space<vmem>>) attributes {dimension_semantics = [#tpu.dimension_semantics<parallel>, #tpu.dimension_semantics<parallel>, #tpu.dimension_semantics<arbitrary>], iteration_bounds = array<i64: 1, 1, 1>, scalar_prefetch = 0 : i64, scratch_operands = 1 : i64, tpu.core_type = #tpu.core_type<tc>, window_params = [{transform_indices = @transform_0, window_bounds = array<i64: 128, 128>}, {transform_indices = @transform_1, window_bounds = array<i64: 128, 128>}, {transform_indices = @transform_2, window_bounds = array<i64: 1, 128>}, {transform_indices = @transform_3, window_bounds = array<i64: 128, 128>}]} {
    %c0_i32 = arith.constant 0 : i32
    %0 = arith.cmpi eq, %arg2, %c0_i32 : i32
    %1 = arith.extui %0 : i1 to i32
    %c0_i32_0 = arith.constant 0 : i32
    %2 = arith.cmpi ne, %1, %c0_i32_0 : i32
    scf.if %2 {
      %cst_10 = arith.constant 0.000000e+00 : f32
      %12 = vector.broadcast %cst_10 : f32 to vector<128x128xf32>
      %c0_11 = arith.constant 0 : index
      %c0_12 = arith.constant 0 : index
      %13 = vector.load %arg7[%c0_11, %c0_12] : memref<128x128xf32, #tpu.memory_space<vmem>>, vector<128x128xf32>
      tpu.vector_store %arg7[%c0_11, %c0_12], %12 {strides = array<i32>} : memref<128x128xf32, #tpu.memory_space<vmem>>, vector<128x128xf32>,
    } else {
    }
    %c0 = arith.constant 0 : index
    %c0_1 = arith.constant 0 : index
    %3 = vector.load %arg7[%c0, %c0_1] : memref<128x128xf32, #tpu.memory_space<vmem>>, vector<128x128xf32>
    %c0_2 = arith.constant 0 : index
    %c0_3 = arith.constant 0 : index
    %4 = vector.load %arg3[%c0_2, %c0_3] : memref<128x128xbf16, #tpu.memory_space<vmem>>, vector<128x128xbf16>
    %c0_4 = arith.constant 0 : index
    %c0_5 = arith.constant 0 : index
    %5 = vector.load %arg4[%c0_4, %c0_5] : memref<128x128xbf16, #tpu.memory_space<vmem>>, vector<128x128xbf16>
    %cst = arith.constant dense<0.000000e+00> : vector<128x128xf32>
    %6 = tpu.matmul %4, %5, %cst {dimension_numbers = #tpu.dot_dimension_numbers<[1], [0], [0], [1], [0, 0, 1, 1], [], []>} : vector<128x128xbf16>, vector<128x128xbf16>, vector<128x128xf32> -> vector<128x128xf32>
    %7 = arith.addf %3, %6 : vector<128x128xf32>
    %c0_6 = arith.constant 0 : index
    %c0_7 = arith.constant 0 : index
    %8 = vector.load %arg7[%c0_6, %c0_7] : memref<128x128xf32, #tpu.memory_space<vmem>>, vector<128x128xf32>
    tpu.vector_store %arg7[%c0_6, %c0_7], %7 {strides = array<i32>} : memref<128x128xf32, #tpu.memory_space<vmem>>, vector<128x128xf32>,
    %c0_i32_8 = arith.constant 0 : i32
    %9 = arith.cmpi eq, %arg2, %c0_i32_8 : i32
    %10 = arith.extui %9 : i1 to i32
    %c0_i32_9 = arith.constant 0 : i32
    %11 = arith.cmpi ne, %10, %c0_i32_9 : i32
    scf.if %11 {
      %c0_10 = arith.constant 0 : index
      %c0_11 = arith.constant 0 : index
      %12 = vector.load %arg7[%c0_10, %c0_11] : memref<128x128xf32, #tpu.memory_space<vmem>>, vector<128x128xf32>
      %c0_12 = arith.constant 0 : index
      %c0_13 = arith.constant 0 : index
      %13 = vector.load %arg5[%c0_12, %c0_13] : memref<1x128xf32, #tpu.memory_space<vmem>>, vector<1x128xf32>
      %14 = vector.broadcast %13 : vector<1x128xf32> to vector<128x128xf32>
      %15 = arith.addf %12, %14 : vector<128x128xf32>
      %cst_14 = arith.constant 0.000000e+00 : f32
      %16 = vector.broadcast %cst_14 : f32 to vector<128x128xf32>
      %17 = arith.maximumf %15, %16 : vector<128x128xf32>
      %c0_15 = arith.constant 0 : index
      %c0_16 = arith.constant 0 : index
      %18 = vector.load %arg6[%c0_15, %c0_16] : memref<128x128xf32, #tpu.memory_space<vmem>>, vector<128x128xf32>
      tpu.vector_store %arg6[%c0_15, %c0_16], %17 {strides = array<i32>} : memref<128x128xf32, #tpu.memory_space<vmem>>, vector<128x128xf32>,
    } else {
    }
    return
  }
  func.func @transform_0(%arg0: i32, %arg1: i32, %arg2: i32) -> (i32, i32) {
    %c0_i32 = arith.constant 0 : i32
    return %arg0, %arg2 : i32, i32
  }
  func.func @transform_1(%arg0: i32, %arg1: i32, %arg2: i32) -> (i32, i32) {
    %c0_i32 = arith.constant 0 : i32
    return %arg2, %arg1 : i32, i32
  }
  func.func @transform_2(%arg0: i32, %arg1: i32, %arg2: i32) -> (i32, i32) {
    %c0_i32 = arith.constant 0 : i32
    %c0_i32_0 = arith.constant 0 : i32
    return %c0_i32, %arg1 : i32, i32
  }
  func.func @transform_3(%arg0: i32, %arg1: i32, %arg2: i32) -> (i32, i32) {
    %c0_i32 = arith.constant 0 : i32
    return %arg0, %arg1 : i32, i32
  }
}

</mosaic_0001>

<bundles_post_ra>
// kernel: tpu_custom_call.1
= control target key start
LH: loop header
LB: loop body
LE: loop exit
PB: predicated region body
PF: predicated region fallthrough
CT: control target
= control target key end

     0   :  { %8 = vsyncpa [#allocation4], 0  ;;  %s671_s0 = inlined_call_operand.hbm [shape: bf16[128,128], index: 0, kind: input, shape index: {}]   ;;  %s672_s1 = inlined_call_operand.hbm [shape: bf16[128,128], index: 1, kind: input, shape index: {}]   ;;  %s673_s2 = inlined_call_operand.vmem [shape: f32[1,128], index: 2, kind: input, shape index: {}]   ;;  %s674_s3 = inlined_call_operand.hbm [shape: f32[128,128], index: 3, kind: output, shape index: {}]  }
   0x1   :  { %9 = vsyncpa [#allocation7], 0 }
   0x2   :  { %10 = vsyncpa [#allocation5], 0  ;;  %s605_s12 = smov [#allocation3]   ;;  %s533_s16 = scalar_lea.hbm %s671_s0, 1024 }
   0x3   :  { %s16_s13 = sshll.u32 %s605_s12, 4  ;;  %p534_p0 = scmp.ne.s32.totalorder %s671_s0, %s533_s16  ;;  %s17_s13 = int_to_ptr.vmem [resolvable:$true] %s16_s13 }
   0x4   :  { %p537_p1 = scmp.lt.u32.totalorder %s533_s16, %s671_s0 }
   0x6   :  { %p539_p2 = pnand %p537_p1, %p534_p0 }
   0x8   :  { %542 = shalt.err (!%p539_p2)
}
   0x9   :  { %s543_s21 = scalar_lea.vmem %s17_s13, 1024  ;;  %p548_p4 = scmp.lt.s32.totalorder %s17_s13, %s17_s13 }
   0xa   :  { %p544_p3 = scmp.ne.s32.totalorder %s17_s13, %s543_s21  ;;  %p549_p5 = scmp.lt.s32.totalorder %s543_s21, %s543_s21 }
   0xc   :  { %p550_p6 = por %p549_p5, %p548_p4 }
   0xe   :  { %p551_p7 = pnand %p550_p6, %p544_p3 }
  0x10   :  { %554 = shalt.err (!%p551_p7)
}
  0x11   :  { %s606_s22 = smov 64   ;;  %s607_s23 = smov 4  }
  0x12   :  { %22 = dma.hbm_to_vmem [thread:$0]  %s671_s0, 1024, %s17_s13, [#allocation4], %s606_s22, %s606_s22, %s607_s23  }
  0x13   :  { %s608_s26 = smov [#allocation6]   ;;  %s555_s30 = scalar_lea.hbm %s672_s1, 1024 }
  0x14   :  { %s28_s27 = sshll.u32 %s608_s26, 4  ;;  %p556_p8 = scmp.ne.s32.totalorder %s672_s1, %s555_s30  ;;  %s29_s27 = int_to_ptr.vmem [resolvable:$true] %s28_s27 }
  0x15   :  { %p559_p9 = scmp.lt.u32.totalorder %s555_s30, %s672_s1 }
  0x17   :  { %p561_p10 = pnand %p559_p9, %p556_p8 }
  0x19   :  { %564 = shalt.err (!%p561_p10)
}
  0x1a   :  { %s565_s8 = scalar_lea.vmem %s29_s27, 1024  ;;  %p570_p12 = scmp.lt.s32.totalorder %s29_s27, %s29_s27 }
  0x1b   :  { %p566_p11 = scmp.ne.s32.totalorder %s29_s27, %s565_s8  ;;  %p571_p13 = scmp.lt.s32.totalorder %s565_s8, %s565_s8 }
  0x1d   :  { %p572_p0 = por %p571_p13, %p570_p12 }
  0x1f   :  { %p573_p1 = pnand %p572_p0, %p566_p11 }
  0x21   :  { %576 = shalt.err (!%p573_p1)
}
  0x22   :  { %34 = dma.hbm_to_vmem [thread:$0]  %s672_s1, 1024, %s29_s27, [#allocation7], %s606_s22, %s606_s22, %s607_s23  }
  0x23   :  { %599 = dma.done.wait [#allocation4], 1024  }
  0x24   :  { %600 = vsyncadd [#allocation4], 4294966272 }
  0x25   :  { %601 = dma.done.wait [#allocation7], 1024  }
  0x26   :  { %602 = vsyncadd [#allocation7], 4294966272  ;;  %v517_v0 = vld [vmem:[#allocation6] sm:$0xff]   ;;  %v518_v1 = vld [vmem:[#allocation6 + $0x8] sm:$0xff]  }
  0x27   :  { %462 = vmatprep.subr.bf16.mxu0 %v517_v0  ;;  %494 = vmatprep.subr.bf16.mxu1 %v517_v0  ;;  %v519_v2 = vld [vmem:[#allocation6 + $0x10] sm:$0xff]   ;;  %v520_v3 = vld [vmem:[#allocation6 + $0x18] sm:$0xff]   ;;  %v525_v4 = vld [vmem:[#allocation3] sm:$0xff]  }
  0x28   :  { %463 = vmatpush3.bf16.msra.mxu0 %v517_v0  ;;  %502 = vmatpush3.bf16.msra.mxu1 %v517_v0  ;;  %v526_v5 = vld [vmem:[#allocation3 + $0x20] sm:$0xff]   ;;  %v522_v7 = vld [vmem:[#allocation6 + $0x28] sm:$0xff]   ;;  %v523_v8 = vld [vmem:[#allocation6 + $0x30] sm:$0xff]  }
  0x29   :  { %464 = vmatprep.subr.bf16.mxu0 %v518_v1  ;;  %495 = vmatprep.subr.bf16.mxu1 %v518_v1  ;;  %v521_v6 = vld [vmem:[#allocation6 + $0x20] sm:$0xff]   ;;  %v524_v9 = vld [vmem:[#allocation6 + $0x38] sm:$0xff]   ;;  %v527_v10 = vld [vmem:[#allocation3 + $0x8] sm:$0xff]  }
  0x2a   :  { %478 = vmatprep.mubr.bf16.mxu0 %v525_v4  ;;  %486 = vmatprep.mubr.bf16.mxu1 %v526_v5  ;;  %v528_v11 = vld [vmem:[#allocation3 + $0x28] sm:$0xff]   ;;  %v529_v12 = vld [vmem:[#allocation3 + $0x10] sm:$0xff]   ;;  %v531_v14 = vld [vmem:[#allocation3 + $0x18] sm:$0xff]  }
  0x2b   :  { %v530_v13 = vld [vmem:[#allocation3 + $0x30] sm:$0xff]   ;;  %v532_v15 = vld [vmem:[#allocation3 + $0x38] sm:$0xff]   ;;  %v445_v16 = vld [vmem:[%s673_s2] ss:$0 sm:$0xff]  ;;  %s609_s2 = smov [#allocation8]  }
  0x2c   :  { %465 = vmatpush3.bf16.msra.mxu0 %v518_v1  ;;  %503 = vmatpush3.bf16.msra.mxu1 %v518_v1  ;;  %s416_s11 = sshll.u32 %s609_s2, 4  ;;  %s417_s11 = int_to_ptr.vmem [resolvable:$true] %s416_s11 }
  0x2d   :  { %466 = vmatprep.subr.bf16.mxu0 %v519_v2  ;;  %496 = vmatprep.subr.bf16.mxu1 %v519_v2  ;;  %s577_s12 = scalar_lea.vmem %s417_s11, 2048  ;;  %p582_p3 = scmp.lt.s32.totalorder %s417_s11, %s417_s11 }
  0x2e   :  { %p578_p2 = scmp.ne.s32.totalorder %s417_s11, %s577_s12  ;;  %p583_p4 = scmp.lt.s32.totalorder %s577_s12, %s577_s12 }
  0x30   :  { %467 = vmatpush3.bf16.msra.mxu0 %v519_v2  ;;  %504 = vmatpush3.bf16.msra.mxu1 %v519_v2  ;;  %p584_p5 = por %p583_p4, %p582_p3 }
  0x31   :  { %468 = vmatprep.subr.bf16.mxu0 %v520_v3  ;;  %497 = vmatprep.subr.bf16.mxu1 %v520_v3 }
  0x32   :  { %p585_p6 = pnand %p584_p5, %p578_p2 }
  0x34   :  { %469 = vmatpush3.bf16.msra.mxu0 %v520_v3  ;;  %505 = vmatpush3.bf16.msra.mxu1 %v520_v3 }
  0x35   :  { %470 = vmatprep.subr.bf16.mxu0 %v521_v6  ;;  %498 = vmatprep.subr.bf16.mxu1 %v521_v6 }
  0x38   :  { %471 = vmatpush3.bf16.msra.mxu0 %v521_v6  ;;  %506 = vmatpush3.bf16.msra.mxu1 %v521_v6 }
  0x39   :  { %472 = vmatprep.subr.bf16.mxu0 %v522_v7  ;;  %499 = vmatprep.subr.bf16.mxu1 %v522_v7 }
  0x3c   :  { %473 = vmatpush3.bf16.msra.mxu0 %v522_v7  ;;  %507 = vmatpush3.bf16.msra.mxu1 %v522_v7 }
  0x3d   :  { %474 = vmatprep.subr.bf16.mxu0 %v523_v8  ;;  %500 = vmatprep.subr.bf16.mxu1 %v523_v8 }
  0x40   :  { %475 = vmatpush3.bf16.msra.mxu0 %v523_v8  ;;  %508 = vmatpush3.bf16.msra.mxu1 %v523_v8 }
  0x41   :  { %476 = vmatprep.subr.bf16.mxu0 %v524_v9  ;;  %501 = vmatprep.subr.bf16.mxu1 %v524_v9 }
  0x44   :  { %477 = vmatpush3.bf16.msra.mxu0 %v524_v9  ;;  %509 = vmatpush3.bf16.msra.mxu1 %v524_v9 }
  0x47   :  { %479 = vmatmul.mubr.bf16.vlgmr.msra.gmra.mrb[0].mxu0 %v527_v10  ;;  %487 = vmatmul.mubr.bf16.vlgmr.msra.gmra.mrb[0].mxu1 %v528_v11 }
  0x48   :  { %482 = vmatprep.mubr.bf16.mxu0 %v529_v12  ;;  %490 = vmatprep.mubr.bf16.mxu1 %v530_v13 }
  0x4f   :  { %483 = vmatmul.mubr.bf16.gmra.mrb[4].mxu0 %v531_v14  ;;  %491 = vmatmul.mubr.bf16.gmra.mrb[4].mxu1 %v532_v15 }
 0x11a   :  { %v480_v17 = vpop.f32.mrb[0].mxu0  ;;  %v488_v18 = vpop.f32.mrb[0].mxu1 }
 0x11b   :  { %v365_v19 = vadd.f32 %v480_v17, %v445_v16  ;;  %v373_v20 = vadd.f32 %v488_v18, %v445_v16  ;;  %v242_v21 = vpop.f32.mrb[1].mxu0  ;;  %v274_v22 = vpop.f32.mrb[1].mxu1 }
 0x11c   :  { %v363_v23 = vadd.f32 %v445_v16, %v242_v21  ;;  %v371_v24 = vadd.f32 %v445_v16, %v274_v22  ;;  %v481_v25 = vpop.f32.mrb[2].mxu0  ;;  %v489_v26 = vpop.f32.mrb[2].mxu1 }
 0x11d   :  { %v381_v27 = vmax.f32 %v365_v19, 0.0  ;;  %v389_v28 = vmax.f32 %v373_v20, 0.0  ;;  %v366_v29 = vadd.f32 %v481_v25, %v445_v16  ;;  %v374_v30 = vadd.f32 %v489_v26, %v445_v16  ;;  %v245_v31 = vpop.f32.mrb[3].mxu0  ;;  %v277_v32 = vpop.f32.mrb[3].mxu1 }
 0x11e   :  { %v379_v33 = vmax.f32 %v363_v23, 0.0  ;;  %v387_v34 = vmax.f32 %v371_v24, 0.0  ;;  %v364_v35 = vadd.f32 %v445_v16, %v245_v31  ;;  %v372_v36 = vadd.f32 %v445_v16, %v277_v32 }
 0x11f   :  { %397 = vst [vmem:[#allocation8 + $0x10] sm:$0xff] %v381_v27  ;;  %405 = vst [vmem:[#allocation8 + $0x50] sm:$0xff] %v389_v28  ;;  %v382_v37 = vmax.f32 %v366_v29, 0.0  ;;  %v390_v38 = vmax.f32 %v374_v30, 0.0 }
 0x120   :  { %395 = vst [vmem:[#allocation8] sm:$0xff] %v379_v33  ;;  %403 = vst [vmem:[#allocation8 + $0x40] sm:$0xff] %v387_v34  ;;  %v380_v39 = vmax.f32 %v364_v35, 0.0  ;;  %v388_v40 = vmax.f32 %v372_v36, 0.0 }
 0x121   :  { %398 = vst [vmem:[#allocation8 + $0x18] sm:$0xff] %v382_v37  ;;  %406 = vst [vmem:[#allocation8 + $0x58] sm:$0xff] %v390_v38 }
 0x122   :  { %396 = vst [vmem:[#allocation8 + $0x8] sm:$0xff] %v380_v39  ;;  %404 = vst [vmem:[#allocation8 + $0x48] sm:$0xff] %v388_v40  ;;  %v484_v41 = vpop.f32.mrb[4].mxu0  ;;  %v492_v42 = vpop.f32.mrb[4].mxu1 }
 0x123   :  { %v369_v43 = vadd.f32 %v484_v41, %v445_v16  ;;  %v377_v44 = vadd.f32 %v492_v42, %v445_v16  ;;  %v258_v45 = vpop.f32.mrb[5].mxu0  ;;  %v290_v46 = vpop.f32.mrb[5].mxu1 }
 0x124   :  { %v367_v47 = vadd.f32 %v445_v16, %v258_v45  ;;  %v375_v48 = vadd.f32 %v445_v16, %v290_v46  ;;  %v485_v49 = vpop.f32.mrb[6].mxu0  ;;  %v493_v50 = vpop.f32.mrb[6].mxu1 }
 0x125   :  { %v385_v51 = vmax.f32 %v369_v43, 0.0  ;;  %v393_v52 = vmax.f32 %v377_v44, 0.0  ;;  %v370_v53 = vadd.f32 %v485_v49, %v445_v16  ;;  %v378_v54 = vadd.f32 %v493_v50, %v445_v16  ;;  %v261_v55 = vpop.f32.mrb[7].mxu0  ;;  %v293_v56 = vpop.f32.mrb[7].mxu1 }
 0x126   :  { %v383_v57 = vmax.f32 %v367_v47, 0.0  ;;  %v391_v58 = vmax.f32 %v375_v48, 0.0  ;;  %v368_v59 = vadd.f32 %v445_v16, %v261_v55  ;;  %v376_v60 = vadd.f32 %v445_v16, %v293_v56 }
 0x127   :  { %401 = vst [vmem:[#allocation8 + $0x30] sm:$0xff] %v385_v51  ;;  %409 = vst [vmem:[#allocation8 + $0x70] sm:$0xff] %v393_v52  ;;  %v386_v61 = vmax.f32 %v370_v53, 0.0  ;;  %v394_v62 = vmax.f32 %v378_v54, 0.0 }
 0x128   :  { %399 = vst [vmem:[#allocation8 + $0x20] sm:$0xff] %v383_v57  ;;  %407 = vst [vmem:[#allocation8 + $0x60] sm:$0xff] %v391_v58  ;;  %v384_v63 = vmax.f32 %v368_v59, 0.0  ;;  %v392_v0 = vmax.f32 %v376_v60, 0.0 }
 0x129   :  { %402 = vst [vmem:[#allocation8 + $0x38] sm:$0xff] %v386_v61  ;;  %410 = vst [vmem:[#allocation8 + $0x78] sm:$0xff] %v394_v62 }
 0x12a   :  { %400 = vst [vmem:[#allocation8 + $0x28] sm:$0xff] %v384_v63  ;;  %408 = vst [vmem:[#allocation8 + $0x68] sm:$0xff] %v392_v0 }
 0x12b   :  { %588 = shalt.err (!%p585_p6)
}
 0x12c   :  { %s589_s15 = scalar_lea.hbm %s674_s3, 2048 }
 0x12d   :  { %p590_p7 = scmp.ne.s32.totalorder %s674_s3, %s589_s15  ;;  %p593_p8 = scmp.lt.u32.totalorder %s589_s15, %s674_s3 }
 0x12f   :  { %p595_p9 = pnand %p593_p8, %p590_p7 }
 0x131   :  { %598 = shalt.err (!%p595_p9)
}
 0x132   :  { %s610_s20 = smov 128   ;;  %s611_s21 = smov 8  }
 0x133   :  { %422 = dma.vmem_to_hbm [thread:$0]  %s417_s11, 2048, %s674_s3, [#allocation5], %s610_s20, %s610_s20, %s611_s21  }
 0x134   :  { %603 = dma.done.wait [#allocation5], 2048  }
 0x135   :  { %604 = vsyncadd [#allocation5], 4294965248 }
 0x136   :  { %426 = vsyncpa [#allocation4], 1 }
 0x137   :  { %427 = vsyncpa [#allocation7], 1 }
 0x138   :  { %428 = vsyncpa [#allocation5], 1 }

</bundles_post_ra>
